<compile_context>
chip_gen: v5e
topology: v5e:2x2
jax: 0.10.0
libtpu: 0.0.40
codegen_flags: <defaults>
</compile_context>

<pallas_src>
import jax
import jax.numpy as jnp
from jax.experimental import pallas as pl
from jax.experimental.pallas import tpu as pltpu

_LANES = 128
_SUBLANES = 8
# Multi-block tile quantum: 16 sublanes x 128 lanes keeps both f32 (8,128) and
# bf16 (16,128) packed layouts dense.
_TILE_QUANTUM = 16 * _LANES

# Per-block VMEM at these sizes (f32 in/out, 3 input + 9 output planes):
#   65536 lanes  -> 3 MiB/block, x2 double-buffered = 6 MiB   (fits v5e 16 MiB scoped default)
#   131072 lanes -> 6 MiB/block, x2 double-buffered = 12 MiB  (fits v6e/v7x 32 MiB default)
_MAX_TILE_LANES_SAFE = 65536
_MAX_TILE_LANES_BIG = 131072
# Only split across TensorCores when each core gets at least this many lanes.
_MIN_LANES_PER_CORE = 65536


def _round_up(x: int, m: int) -> int:
    return ((x + m - 1) // m) * m


def _tpu_hints():
    """(num_tensorcores_per_chip, max_tile_lanes), conservative on failure."""
    num_tc = 1
    max_tile = _MAX_TILE_LANES_SAFE
    try:
        kind = jax.devices()[0].device_kind.lower()
    except Exception:
        return num_tc, max_tile
    if ("v6" in kind) or ("v7" in kind):
        max_tile = _MAX_TILE_LANES_BIG
    if "v7" in kind:
        num_tc = 2
    return num_tc, max_tile


def _choose_tiling(n_rays: int, num_tc: int, max_tile_lanes: int):
    """Pick (tile_lanes, num_blocks, padded_lanes) for a 1-D 'parallel' grid."""
    n128 = _round_up(max(int(n_rays), 1), _LANES)
    num_blocks = pl.cdiv(n128, max_tile_lanes)
    # Only force a split when the chip actually has >1 TensorCore AND each
    # core gets enough work to amortize per-step / DMA-ramp overhead.
    if num_blocks == 1 and num_tc >= 2 and n128 >= num_tc * _MIN_LANES_PER_CORE:
        num_blocks = num_tc
    if num_blocks == 1:
        tile = n128  # single block == full array -> any multiple of 128 is fine
    else:
        tile = _round_up(pl.cdiv(n128, num_blocks), _TILE_QUANTUM)
        num_blocks = pl.cdiv(n128, tile)  # never emit an all-padding tail block
    return tile, num_blocks, tile * num_blocks


def _feature_names(degree: int, include_constant: bool):
    out_dim = (degree + 1) ** 2
    names = ["const"]
    if degree >= 1:
        names += ["x", "y", "z"]
    if degree >= 2:
        names += ["xy", "xz", "yz", "xx_yy", "zz"]
    names = names[:out_dim]  # mirrors the PyTorch features[:output_dim] slice
    if not include_constant:
        names = [n for n in names if n != "const"]
    return names


def _make_kernel(degree: int, include_constant: bool):
    names = _feature_names(degree, include_constant)
    n_feat = len(names)

    def kernel(dir_ref, out_ref):
        # dir_ref: (3, TS, 128)   out_ref: (n_feat, TS, 128)   -- lane-dense planes
        x = dir_ref[0].astype(jnp.float32)
        y = dir_ref[1].astype(jnp.float32)
        z = dir_ref[2].astype(jnp.float32)
        table = {
            "const": lambda: jnp.full_like(x, 0.5),
            "x": lambda: x,
            "y": lambda: y,
            "z": lambda: z,
            "xy": lambda: x * y,
            "xz": lambda: x * z,
            "yz": lambda: y * z,
            "xx_yy": lambda: x * x - y * y,
            "zz": lambda: 3.0 * z * z - 1.0,
        }
        od = out_ref.dtype
        for i, name in enumerate(names):
            out_ref[i] = table[name]().astype(od)  # full (TS,128) dense store

    return kernel, n_feat


def _encode_padded_soa(dirs_soa_padded, degree, out_dtype, tile, num_blocks,
                       include_constant):
    """dirs_soa_padded: (3, n_pad) with n_pad == tile * num_blocks."""
    n_pad = dirs_soa_padded.shape[1]
    ts = tile // _LANES
    s_total = n_pad // _LANES
    kernel, n_feat = _make_kernel(degree, include_constant)

    # Free (row-major) reshape: fold rays into (sublane, lane) so every block
    # is made of full, unmasked vregs.
    d3 = dirs_soa_padded.reshape(3, s_total, _LANES)

    out3 = pl.pallas_call(
        kernel,
        out_shape=jax.ShapeDtypeStruct((n_feat, s_total, _LANES), out_dtype),
        grid=(num_blocks,),
        in_specs=[pl.BlockSpec((3, ts, _LANES), lambda i: (0, i, 0))],
        out_specs=pl.BlockSpec((n_feat, ts, _LANES), lambda i: (0, i, 0)),
        compiler_params=pltpu.CompilerParams(
            dimension_semantics=("parallel",),
        ),
    )(d3)
    return out3.reshape(n_feat, n_pad), n_feat


def spherical_harmonics_encode_soa(dirs_soa, degree: int = 4,
                                   out_dtype=jnp.float32,
                                   include_constant: bool = True):
    """Lane-dense fast path: (3, N) structure-of-arrays in -> (F, N) out.

    No transposes or layout plumbing: moves only the bytes the op fundamentally
    needs (12 B/ray in + 36 B/ray out for f32; halved with bf16 in/out).
    bf16 `dirs_soa` is accepted (the kernel upcasts internally).
    Set include_constant=False to drop the constant 0.5 plane and fold it into
    the next layer's bias (saves ~1/9 of output bytes).
    """
    assert dirs_soa.shape[0] == 3
    assert len(_feature_names(degree, include_constant)) > 0
    n = dirs_soa.shape[1]
    num_tc, max_tile = _tpu_hints()
    tile, nb, n_pad = _choose_tiling(n, num_tc, max_tile)
    d = dirs_soa if n_pad == n else jnp.pad(dirs_soa, ((0, 0), (0, n_pad - n)))
    feat, _ = _encode_padded_soa(d, degree, out_dtype, tile, nb, include_constant)
    return feat if n_pad == n else feat[:, :n]


def spherical_harmonics_encode(directions, degree: int = 4,
                               out_dtype=jnp.float32):
    """Module-semantics wrapper: (..., 3) -> (..., F).

    Preserves the PyTorch layout contract.  The AoS->SoA input transpose and
    the (F,N)->(N,F) output transpose are XLA layout plumbing that costs more
    HBM traffic than the kernel itself; consumers that can contract over
    axis 0 (e.g. the first MLP matmul) should call
    spherical_harmonics_encode_soa and skip both.
    """
    assert directions.shape[-1] == 3
    lead = directions.shape[:-1]
    d = directions.reshape(-1, 3)
    n = d.shape[0]
    num_tc, max_tile = _tpu_hints()
    tile, nb, n_pad = _choose_tiling(n, num_tc, max_tile)
    # Transpose *before* padding so XLA can fuse the pad into the layout copy.
    d_soa = d.T
    if n_pad != n:
        d_soa = jnp.pad(d_soa, ((0, 0), (0, n_pad - n)))
    feat, n_feat = _encode_padded_soa(d_soa, degree, out_dtype, tile, nb, True)
    out = feat[:, :n].T  # layout plumbing required by the (..., F) contract
    return out.reshape(*lead, n_feat)


def _reference(directions, degree: int = 4):
    """Pure-JAX mirror of the PyTorch forward (for validation)."""
    out_dim = (degree + 1) ** 2
    x = directions[..., 0]
    y = directions[..., 1]
    z = directions[..., 2]
    feats = [jnp.ones_like(x) * 0.5]
    if degree >= 1:
        feats.extend([x, y, z])
    if degree >= 2:
        feats.extend([x * y, x * z, y * z, x * x - y * y, 3 * z * z - 1])
    return jnp.stack(feats[:out_dim], axis=-1)


if __name__ == "__main__":
    key = jax.random.PRNGKey(0)
    k1, k2 = jax.random.split(key)

    # Small module-shaped input: 2 bundles x 64 viewing directions.
    dirs = jax.random.normal(k1, (2, 64, 3), dtype=jnp.float32)
    dirs = dirs / jnp.linalg.norm(dirs, axis=-1, keepdims=True)
    out = jax.block_until_ready(spherical_harmonics_encode(dirs, degree=4))
    ref = _reference(dirs, degree=4)
    assert out.shape == (2, 64, 9), out.shape
    assert jnp.allclose(out, ref, atol=1e-6, rtol=1e-6), "mismatch (small case)"

    # Larger case: 32768 rays -> single dense block on single-TC chips.
    dirs2 = jax.random.normal(k2, (4, 8192, 3), dtype=jnp.float32)
    dirs2 = dirs2 / jnp.linalg.norm(dirs2, axis=-1, keepdims=True)
    out2 = jax.block_until_ready(spherical_harmonics_encode(dirs2, degree=4))
    ref2 = _reference(dirs2, degree=4)
    assert out2.shape == (4, 8192, 9), out2.shape
    assert jnp.allclose(out2, ref2, atol=1e-6, rtol=1e-6), "mismatch (large case)"

    # Lane-dense SoA fast path (no transposes), f32 / bf16 / no-constant-plane.
    dirs_soa = dirs2.reshape(-1, 3).T  # demo-only transpose to build SoA input
    ref_soa = ref2.reshape(-1, 9).T
    out_soa = jax.block_until_ready(
        spherical_harmonics_encode_soa(dirs_soa, degree=4))
    assert out_soa.shape == (9, 4 * 8192), out_soa.shape
    assert jnp.allclose(out_soa, ref_soa, atol=1e-6, rtol=1e-6), "mismatch (SoA)"

    out_bf16 = jax.block_until_ready(
        spherical_harmonics_encode_soa(dirs_soa, degree=4,
                                       out_dtype=jnp.bfloat16))
    assert out_bf16.dtype == jnp.bfloat16
    assert jnp.allclose(out_bf16.astype(jnp.float32), ref_soa,
                        atol=2e-2, rtol=2e-2), "mismatch (bf16)"

    out_nc = jax.block_until_ready(
        spherical_harmonics_encode_soa(dirs_soa, degree=4,
                                       include_constant=False))
    assert out_nc.shape == (8, 4 * 8192), out_nc.shape
    assert jnp.allclose(out_nc, ref_soa[1:], atol=1e-6, rtol=1e-6), \
        "mismatch (no-constant variant)"

    print("KERNEL_OK")
</pallas_src>

<mosaic_0001>
module attributes {stable_mosaic.version = 11 : i64} {
  func.func @kernel(%arg0: i32, %arg1: memref<3x1x128xf32, #tpu.memory_space<vmem>>, %arg2: memref<9x1x128xf32, #tpu.memory_space<vmem>>) attributes {dimension_semantics = [#tpu.dimension_semantics<parallel>], iteration_bounds = array<i64: 1>, scalar_prefetch = 0 : i64, scratch_operands = 0 : i64, tpu.core_type = #tpu.core_type<tc>, window_params = [{transform_indices = @transform_0, window_bounds = array<i64: 3, 1, 128>}, {transform_indices = @transform_1, window_bounds = array<i64: 9, 1, 128>}]} {
    %c0 = arith.constant 0 : index
    %c0_0 = arith.constant 0 : index
    %c0_1 = arith.constant 0 : index
    %0 = vector.load %arg1[%c0, %c0_0, %c0_1] : memref<3x1x128xf32, #tpu.memory_space<vmem>>, vector<1x1x128xf32>
    %1 = vector.shape_cast %0 : vector<1x1x128xf32> to vector<1x128xf32>
    %c1 = arith.constant 1 : index
    %c0_2 = arith.constant 0 : index
    %c0_3 = arith.constant 0 : index
    %2 = vector.load %arg1[%c1, %c0_2, %c0_3] : memref<3x1x128xf32, #tpu.memory_space<vmem>>, vector<1x1x128xf32>
    %3 = vector.shape_cast %2 : vector<1x1x128xf32> to vector<1x128xf32>
    %c2 = arith.constant 2 : index
    %c0_4 = arith.constant 0 : index
    %c0_5 = arith.constant 0 : index
    %4 = vector.load %arg1[%c2, %c0_4, %c0_5] : memref<3x1x128xf32, #tpu.memory_space<vmem>>, vector<1x1x128xf32>
    %5 = vector.shape_cast %4 : vector<1x1x128xf32> to vector<1x128xf32>
    %cst = arith.constant 5.000000e-01 : f32
    %6 = vector.broadcast %cst : f32 to vector<1x128xf32>
    %c0_6 = arith.constant 0 : index
    %c0_7 = arith.constant 0 : index
    %c0_8 = arith.constant 0 : index
    %7 = vector.load %arg2[%c0_6, %c0_7, %c0_8] : memref<9x1x128xf32, #tpu.memory_space<vmem>>, vector<1x1x128xf32>
    %8 = vector.shape_cast %7 : vector<1x1x128xf32> to vector<1x128xf32>
    %9 = vector.shape_cast %6 : vector<1x128xf32> to vector<1x1x128xf32>
    tpu.vector_store %arg2[%c0_6, %c0_7, %c0_8], %9 {strides = array<i32>} : memref<9x1x128xf32, #tpu.memory_space<vmem>>, vector<1x1x128xf32>,
    %c1_9 = arith.constant 1 : index
    %c0_10 = arith.constant 0 : index
    %c0_11 = arith.constant 0 : index
    %10 = vector.load %arg2[%c1_9, %c0_10, %c0_11] : memref<9x1x128xf32, #tpu.memory_space<vmem>>, vector<1x1x128xf32>
    %11 = vector.shape_cast %10 : vector<1x1x128xf32> to vector<1x128xf32>
    %12 = vector.shape_cast %1 : vector<1x128xf32> to vector<1x1x128xf32>
    tpu.vector_store %arg2[%c1_9, %c0_10, %c0_11], %12 {strides = array<i32>} : memref<9x1x128xf32, #tpu.memory_space<vmem>>, vector<1x1x128xf32>,
    %c2_12 = arith.constant 2 : index
    %c0_13 = arith.constant 0 : index
    %c0_14 = arith.constant 0 : index
    %13 = vector.load %arg2[%c2_12, %c0_13, %c0_14] : memref<9x1x128xf32, #tpu.memory_space<vmem>>, vector<1x1x128xf32>
    %14 = vector.shape_cast %13 : vector<1x1x128xf32> to vector<1x128xf32>
    %15 = vector.shape_cast %3 : vector<1x128xf32> to vector<1x1x128xf32>
    tpu.vector_store %arg2[%c2_12, %c0_13, %c0_14], %15 {strides = array<i32>} : memref<9x1x128xf32, #tpu.memory_space<vmem>>, vector<1x1x128xf32>,
    %c3 = arith.constant 3 : index
    %c0_15 = arith.constant 0 : index
    %c0_16 = arith.constant 0 : index
    %16 = vector.load %arg2[%c3, %c0_15, %c0_16] : memref<9x1x128xf32, #tpu.memory_space<vmem>>, vector<1x1x128xf32>
    %17 = vector.shape_cast %16 : vector<1x1x128xf32> to vector<1x128xf32>
    %18 = vector.shape_cast %5 : vector<1x128xf32> to vector<1x1x128xf32>
    tpu.vector_store %arg2[%c3, %c0_15, %c0_16], %18 {strides = array<i32>} : memref<9x1x128xf32, #tpu.memory_space<vmem>>, vector<1x1x128xf32>,
    %19 = arith.mulf %1, %3 : vector<1x128xf32>
    %c4 = arith.constant 4 : index
    %c0_17 = arith.constant 0 : index
    %c0_18 = arith.constant 0 : index
    %20 = vector.load %arg2[%c4, %c0_17, %c0_18] : memref<9x1x128xf32, #tpu.memory_space<vmem>>, vector<1x1x128xf32>
    %21 = vector.shape_cast %20 : vector<1x1x128xf32> to vector<1x128xf32>
    %22 = vector.shape_cast %19 : vector<1x128xf32> to vector<1x1x128xf32>
    tpu.vector_store %arg2[%c4, %c0_17, %c0_18], %22 {strides = array<i32>} : memref<9x1x128xf32, #tpu.memory_space<vmem>>, vector<1x1x128xf32>,
    %23 = arith.mulf %1, %5 : vector<1x128xf32>
    %c5 = arith.constant 5 : index
    %c0_19 = arith.constant 0 : index
    %c0_20 = arith.constant 0 : index
    %24 = vector.load %arg2[%c5, %c0_19, %c0_20] : memref<9x1x128xf32, #tpu.memory_space<vmem>>, vector<1x1x128xf32>
    %25 = vector.shape_cast %24 : vector<1x1x128xf32> to vector<1x128xf32>
    %26 = vector.shape_cast %23 : vector<1x128xf32> to vector<1x1x128xf32>
    tpu.vector_store %arg2[%c5, %c0_19, %c0_20], %26 {strides = array<i32>} : memref<9x1x128xf32, #tpu.memory_space<vmem>>, vector<1x1x128xf32>,
    %27 = arith.mulf %3, %5 : vector<1x128xf32>
    %c6 = arith.constant 6 : index
    %c0_21 = arith.constant 0 : index
    %c0_22 = arith.constant 0 : index
    %28 = vector.load %arg2[%c6, %c0_21, %c0_22] : memref<9x1x128xf32, #tpu.memory_space<vmem>>, vector<1x1x128xf32>
    %29 = vector.shape_cast %28 : vector<1x1x128xf32> to vector<1x128xf32>
    %30 = vector.shape_cast %27 : vector<1x128xf32> to vector<1x1x128xf32>
    tpu.vector_store %arg2[%c6, %c0_21, %c0_22], %30 {strides = array<i32>} : memref<9x1x128xf32, #tpu.memory_space<vmem>>, vector<1x1x128xf32>,
    %31 = arith.mulf %1, %1 : vector<1x128xf32>
    %32 = arith.mulf %3, %3 : vector<1x128xf32>
    %33 = arith.subf %31, %32 : vector<1x128xf32>
    %c7 = arith.constant 7 : index
    %c0_23 = arith.constant 0 : index
    %c0_24 = arith.constant 0 : index
    %34 = vector.load %arg2[%c7, %c0_23, %c0_24] : memref<9x1x128xf32, #tpu.memory_space<vmem>>, vector<1x1x128xf32>
    %35 = vector.shape_cast %34 : vector<1x1x128xf32> to vector<1x128xf32>
    %36 = vector.shape_cast %33 : vector<1x128xf32> to vector<1x1x128xf32>
    tpu.vector_store %arg2[%c7, %c0_23, %c0_24], %36 {strides = array<i32>} : memref<9x1x128xf32, #tpu.memory_space<vmem>>, vector<1x1x128xf32>,
    %cst_25 = arith.constant 3.000000e+00 : f32
    %37 = vector.broadcast %cst_25 : f32 to vector<1x128xf32>
    %38 = arith.mulf %37, %5 : vector<1x128xf32>
    %39 = arith.mulf %38, %5 : vector<1x128xf32>
    %cst_26 = arith.constant 1.000000e+00 : f32
    %40 = vector.broadcast %cst_26 : f32 to vector<1x128xf32>
    %41 = arith.subf %39, %40 : vector<1x128xf32>
    %c8 = arith.constant 8 : index
    %c0_27 = arith.constant 0 : index
    %c0_28 = arith.constant 0 : index
    %42 = vector.load %arg2[%c8, %c0_27, %c0_28] : memref<9x1x128xf32, #tpu.memory_space<vmem>>, vector<1x1x128xf32>
    %43 = vector.shape_cast %42 : vector<1x1x128xf32> to vector<1x128xf32>
    %44 = vector.shape_cast %41 : vector<1x128xf32> to vector<1x1x128xf32>
    tpu.vector_store %arg2[%c8, %c0_27, %c0_28], %44 {strides = array<i32>} : memref<9x1x128xf32, #tpu.memory_space<vmem>>, vector<1x1x128xf32>,
    return
  }
  func.func @transform_0(%arg0: i32) -> (i32, i32, i32) {
    %c0_i32 = arith.constant 0 : i32
    %c0_i32_0 = arith.constant 0 : i32
    %c0_i32_1 = arith.constant 0 : i32
    return %c0_i32, %arg0, %c0_i32_0 : i32, i32, i32
  }
  func.func @transform_1(%arg0: i32) -> (i32, i32, i32) {
    %c0_i32 = arith.constant 0 : i32
    %c0_i32_0 = arith.constant 0 : i32
    %c0_i32_1 = arith.constant 0 : i32
    return %c0_i32, %arg0, %c0_i32_0 : i32, i32, i32
  }
}

</mosaic_0001>

<bundles_post_ra>
// kernel: tpu_custom_call.1
= control target key start
LH: loop header
LB: loop body
LE: loop exit
PB: predicated region body
PF: predicated region fallthrough
CT: control target
= control target key end

     0   :  { %6 = vsyncpa [#allocation3], 0  ;;  %s160_s0 = inlined_call_operand.hbm [shape: f32[3,1,128], index: 0, kind: input, shape index: {}]   ;;  %s161_s1 = inlined_call_operand.hbm [shape: f32[9,1,128], index: 1, kind: output, shape index: {}]  }
   0x1   :  { %7 = vsyncpa [#allocation4], 0  ;;  %s12_s8 = sshll.u32 %s160_s0, 4  ;;  %s133_s9 = smov [#allocation2]   ;;  %s13_s8 = int_to_ptr.hbm [resolvable:$true] %s12_s8 }
   0x2   :  { %s14_s10 = sshll.u32 %s133_s9, 4  ;;  %s134_s11 = smov 16   ;;  %s15_s10 = int_to_ptr.vmem [resolvable:$true] %s14_s10 }
   0x3   :  { %s135_s12 = smov 1  }
   0x4   :  { %20 = dma.hbm_to_vmem [thread:$0]  %s13_s8, 48, %s15_s10, [#allocation3], %s134_s11, %s134_s11, %s135_s12  }
   0x5   :  { %129 = dma.done.wait [#allocation3], 48  }
   0x6   :  { %130 = vsyncadd [#allocation3], 4294967248  ;;  %v136_v0 = vmov 0.5   ;;  %v25_v1 = vld [vmem:[#allocation2] sm:$0x1]  ;;  %s137_s0 = smov [#allocation5]  }
   0x7   :  { %30 = vst [vmem:[#allocation5] sm:$0x1] %v136_v0  ;;  %v27_v2 = vld [vmem:[#allocation2 + $0x1] sm:$0x1]  ;;  %v29_v3 = vld [vmem:[#allocation2 + $0x2] sm:$0x1]  ;;  %v46_v6 = vmul.f32 %v25_v1, %v25_v1 }
   0x8   :  { %32 = vst [vmem:[#allocation5 + $0x1] sm:$0x1] %v25_v1  ;;  %v37_v4 = vmul.f32 %v27_v2, %v25_v1  ;;  %v40_v5 = vmul.f32 %v29_v3, %v25_v1  ;;  %v43_v7 = vmul.f32 %v29_v3, %v27_v2  ;;  %v47_v8 = vmul.f32 %v27_v2, %v27_v2  ;;  %s60_s13 = sshll.u32 %s137_s0, 4  ;;  %s62_s16 = sshll.u32 %s161_s1, 4  ;;  %s61_s13 = int_to_ptr.vmem [resolvable:$true] %s60_s13  ;;  %s63_s16 = int_to_ptr.hbm [resolvable:$true] %s62_s16 }
   0x9   :  { %34 = vst [vmem:[#allocation5 + $0x2] sm:$0x1] %v27_v2  ;;  %v51_v9 = vmul.f32 3.0, %v29_v3 }
   0xa   :  { %36 = vst [vmem:[#allocation5 + $0x3] sm:$0x1] %v29_v3  ;;  %v48_v10 = vsub.f32 %v46_v6, %v47_v8 }
   0xb   :  { %39 = vst [vmem:[#allocation5 + $0x4] sm:$0x1] %v37_v4  ;;  %v52_v11 = vmul.f32 %v51_v9, %v29_v3 }
   0xc   :  { %42 = vst [vmem:[#allocation5 + $0x5] sm:$0x1] %v40_v5 }
   0xd   :  { %45 = vst [vmem:[#allocation5 + $0x6] sm:$0x1] %v43_v7  ;;  %v75_v12 = vadd.f32 -1.0, %v52_v11 }
   0xe   :  { %50 = vst [vmem:[#allocation5 + $0x7] sm:$0x1] %v48_v10 }
   0xf   :  { %55 = vst [vmem:[#allocation5 + $0x8] sm:$0x1] %v75_v12 }
  0x10   :  { %68 = dma.vmem_to_hbm [thread:$0]  %s61_s13, 144, %s63_s16, [#allocation4], %s134_s11, %s134_s11, %s135_s12  }
  0x11   :  { %131 = dma.done.wait [#allocation4], 144  }
  0x12   :  { %132 = vsyncadd [#allocation4], 4294967152 }
  0x13   :  { %73 = vsyncpa [#allocation3], 1 }
  0x14   :  { %74 = vsyncpa [#allocation4], 1 }

</bundles_post_ra>
